<compile_context>
chip_gen: v6e
topology: v6e:2x2x1
jax: 0.10.0
libtpu: 0.0.40
codegen_flags: <defaults>
</compile_context>

<pallas_src>
import functools

import jax
import jax.numpy as jnp
from jax.experimental import pallas as pl
from jax.experimental.pallas import tpu as pltpu


def _round_up(a, b):
    return (a + b - 1) // b * b


def _vmem_limit_bytes():
    """Scoped-VMEM limit to request: ~3/4 of physical, capped at 96 MiB."""
    cap = 64 * 1024 * 1024          # conservative fallback (v7x per-TC physical)
    try:
        cap = int(getattr(pltpu.get_tpu_info(), "vmem_capacity_bytes", cap))
    except Exception:
        pass
    return min((cap * 3) // 4, 96 * 1024 * 1024)


def _replicated_spec(shape, single_buffer):
    """Constant-index BlockSpec for weight/bias.

    When the operand is large, ask for a single pipeline buffer (its index_map is
    constant, so a second buffer is pure VMEM waste — matters on v7x's 64 MiB).
    """
    index_map = lambda i, j: (0,) * len(shape)
    if single_buffer:
        try:
            return pl.BlockSpec(shape, index_map, pipeline_mode=pl.Buffered(1))
        except (TypeError, AttributeError):
            pass
    return pl.BlockSpec(shape, index_map)


def _conv1d_relu_taps_kernel(x_ref, w_ref, b_ref, o_ref, *, batch_block):
    # x_ref: (B, K*C_in, TL) pre-unfolded taps; w_ref: (C_out, K*C_in);
    # b_ref: (C_out, 1); o_ref: (B, C_out, TL) — lane-dense stores.
    w = w_ref[...]
    bias = jnp.broadcast_to(b_ref[...].astype(jnp.float32),
                            (o_ref.shape[-2], o_ref.shape[-1]))   # hoisted broadcast
    for b in range(batch_block):                                   # static unroll
        acc = jnp.dot(w, x_ref[b], preferred_element_type=jnp.float32)
        o_ref[b] = jnp.maximum(acc + bias, 0.0).astype(o_ref.dtype)


def _conv1d_relu_halo_kernel(xm_ref, xh_ref, w_ref, b_ref, o_ref, *,
                             num_taps, c_in, tile_l, fuse_taps):
    # xm_ref: (C_in, TL) main block; xh_ref: (C_in, HALO) halo block — both taken
    # from the SAME zero-padded array by two BlockSpecs (no wrapper-side gather).
    xw = jnp.concatenate([xm_ref[...], xh_ref[...]], axis=-1)   # lane-aligned concat
    w = w_ref[...]                                              # (C_out, K*C_in)
    if fuse_taps:
        # Small contraction: fuse all taps into one MXU call.
        x_unf = jnp.concatenate(
            [xw[:, kk:kk + tile_l] for kk in range(num_taps)], axis=0)
        acc = jnp.dot(w, x_unf, preferred_element_type=jnp.float32)
    else:
        # C_in already fills the MXU contraction: K accumulating matmuls,
        # no K-fold copy of the tile.
        acc = jnp.dot(w[:, :c_in], xw[:, :tile_l],
                      preferred_element_type=jnp.float32)
        for kk in range(1, num_taps):
            acc = acc + jnp.dot(w[:, kk * c_in:(kk + 1) * c_in],
                                xw[:, kk:kk + tile_l],
                                preferred_element_type=jnp.float32)
    acc = acc + b_ref[...].astype(jnp.float32)
    o_ref[...] = jnp.maximum(acc, 0.0).astype(o_ref.dtype)


def conv1d_relu(x_ncl, weight, bias, *, stride=1, padding=0, max_tile_l=None):
    """Conv1d(stride, padding) + ReLU.

    x_ncl  : (N, C_in, L)      PyTorch NCW layout (kept; no transposes)
    weight : (C_out, C_in, K)  PyTorch Conv1d weight layout
    bias   : (C_out,)
    returns: (N, C_out, L_out) exact shape (no padded columns)
    """
    n, c_in, length = x_ncl.shape
    c_out, c_in_w, k = weight.shape
    assert c_in == c_in_w, "channel mismatch"
    assert stride >= 1
    l_out = (length + 2 * padding - k) // stride + 1
    assert l_out > 0, "empty output"

    itemsize = jnp.dtype(x_ncl.dtype).itemsize
    sublane = max(1, 32 // itemsize)                 # 8 rows f32, 16 rows bf16
    kc = k * c_in

    # Weight flattened to (C_out, K*C_in); tap-major columns match both paths.
    w2 = jnp.transpose(weight, (0, 2, 1)).reshape(c_out, kc)
    b2 = bias.reshape(c_out, 1)
    big_w = c_out * kc * itemsize > (2 << 20)
    w_spec = _replicated_spec((c_out, kc), big_w)
    b_spec = _replicated_spec((c_out, 1), False)

    vmem_limit = _vmem_limit_bytes()
    budget = vmem_limit // 2                         # target for tile double-buffers

    # Tiny C_in under-fills the sublane dim and makes halo plumbing pointless;
    # pre-unfold the taps instead (this is also the stride>1 fallback).
    use_taps = (stride != 1) or (c_in < sublane)

    if use_taps:
        # ---- taps path: wrapper-side unfold, batched fused-matmul kernel ----
        xp = jnp.pad(x_ncl, ((0, 0), (0, 0), (padding, padding)))
        span = (l_out - 1) * stride + 1
        x_in = jnp.concatenate(
            [xp[:, :, kk:kk + span:stride] for kk in range(k)], axis=1
        )                                             # (N, K*C_in, L_out)

        per_lane = 2 * (kc + c_out) * itemsize        # dbl-buffered in + out
        tl_cap = max(128, min(8192, (budget // per_lane) // 128 * 128))
        if max_tile_l is not None:
            tl_cap = min(tl_cap, max_tile_l)
        tl = l_out if l_out <= tl_cap else tl_cap     # exact shape if single tile
        n_l_tiles = pl.cdiv(l_out, tl)

        # Batch block: amortize per-step overhead, but keep >= 2 "parallel" grid
        # steps when N >= 2 so both v7x TensorCores are used.
        b_max = max(1, budget // max(2 * (kc + c_out) * tl * itemsize, 1))
        if n <= 1:
            bb = 1
        elif n_l_tiles >= 2:
            bb = min(b_max, n)
        else:
            bb = min(b_max, max(1, n // 2))
        while n % bb:
            bb -= 1

        if n // bb == 1 and n_l_tiles == 1 and l_out >= 256:
            # Single-step grid would idle one v7x TensorCore: split the L tile.
            tl = _round_up(pl.cdiv(l_out, 2), 128)
            n_l_tiles = pl.cdiv(l_out, tl)

        kernel = functools.partial(_conv1d_relu_taps_kernel, batch_block=bb)
        grid = (n // bb, n_l_tiles)
        in_specs = [pl.BlockSpec((bb, kc, tl), lambda i, j: (i, 0, j)),
                    w_spec, b_spec]
        out_spec = pl.BlockSpec((bb, c_out, tl), lambda i, j: (i, 0, j))
        operands = (x_in, w2, b2)
    else:
        # ---- halo path: no window materialization; two BlockSpecs over the same
        # zero-padded array (main TL block + trailing HALO block). ----
        halo = max(128, _round_up(k - 1, 128))        # lane-aligned halo >= K-1
        per_lane = 2 * (c_in + c_out) * itemsize
        tl_cap = max(halo, min(8192, (budget // per_lane) // halo * halo))
        if max_tile_l is not None:
            tl_cap = max(halo, min(tl_cap, max_tile_l // halo * halo))
        tl = min(tl_cap, _round_up(l_out, halo))      # multiple of halo
        n_l_tiles = pl.cdiv(l_out, tl)

        if n == 1 and n_l_tiles == 1 and l_out > halo:
            # Single-step grid would idle one v7x TensorCore: split the L tile.
            tl = max(halo, _round_up(pl.cdiv(l_out, 2), halo))
            n_l_tiles = pl.cdiv(l_out, tl)

        l_x = n_l_tiles * tl + halo                   # main tiles + trailing halo
        x_in = jnp.pad(x_ncl,
                       ((0, 0), (0, 0), (padding, l_x - length - padding)))

        halo_blocks_per_tile = tl // halo
        fuse_taps = kc <= 128                         # fits MXU contraction everywhere
        kernel = functools.partial(_conv1d_relu_halo_kernel, num_taps=k,
                                   c_in=c_in, tile_l=tl, fuse_taps=fuse_taps)
        grid = (n, n_l_tiles)
        in_specs = [
            pl.BlockSpec((None, c_in, tl), lambda i, j: (i, 0, j)),
            pl.BlockSpec((None, c_in, halo),
                         lambda i, j: (i, 0, (j + 1) * halo_blocks_per_tile)),
            w_spec, b_spec]
        out_spec = pl.BlockSpec((None, c_out, tl), lambda i, j: (i, 0, j))
        operands = (x_in, x_in, w2, b2)

    cost = pl.CostEstimate(
        flops=2 * n * l_out * kc * c_out,
        transcendentals=0,
        bytes_accessed=int((n * c_in * length + c_out * kc + c_out
                            + n * c_out * l_out) * itemsize))

    return pl.pallas_call(
        kernel,
        out_shape=jax.ShapeDtypeStruct((n, c_out, l_out), x_ncl.dtype),
        grid=grid,
        in_specs=in_specs,
        out_specs=out_spec,
        compiler_params=pltpu.CompilerParams(
            dimension_semantics=("parallel", "parallel"),
            vmem_limit_bytes=int(vmem_limit)),
        cost_estimate=cost,
    )(*operands)


def _reference(x_ncl, weight, bias, *, stride, padding):
    """Pure-JAX reference matching torch.nn.Conv1d + ReLU."""
    out = jax.lax.conv_general_dilated(
        x_ncl, weight,
        window_strides=(stride,),
        padding=[(padding, padding)],
        dimension_numbers=("NCH", "OIH", "NCH"))
    return jnp.maximum(out + bias[None, :, None], 0.0)


def _run_case(key, n, c_in, c_out, length, k, stride, padding,
              max_tile_l=None, tol=1e-5):
    kx, kw, kb = jax.random.split(key, 3)
    x = jax.random.normal(kx, (n, c_in, length), dtype=jnp.float32)
    bound = 1.0 / (c_in * k) ** 0.5                       # PyTorch-style init
    weight = jax.random.uniform(kw, (c_out, c_in, k), minval=-bound,
                                maxval=bound, dtype=jnp.float32)
    bias = jax.random.uniform(kb, (c_out,), minval=-bound, maxval=bound,
                              dtype=jnp.float32)
    out = jax.block_until_ready(
        conv1d_relu(x, weight, bias, stride=stride, padding=padding,
                    max_tile_l=max_tile_l))
    ref = _reference(x, weight, bias, stride=stride, padding=padding)
    assert out.shape == ref.shape, (out.shape, ref.shape)
    assert jnp.allclose(out, ref, atol=tol, rtol=tol), (
        f"mismatch n={n} c_in={c_in} c_out={c_out} L={length} "
        f"k={k} s={stride} p={padding}")


if __name__ == "__main__":
    keys = jax.random.split(jax.random.PRNGKey(0), 7)

    # The module spec's three configurations (all stride=1).
    _run_case(keys[0], 2, 4, 8, 16, 3, 1, 1)
    _run_case(keys[1], 2, 4, 8, 16, 5, 1, 2)
    _run_case(keys[2], 2, 4, 8, 16, 7, 1, 3)

    # Coverage for the other kernel paths (small shapes; max_tile_l forces tiling).
    _run_case(keys[3], 2, 4, 8, 300, 3, 1, 1, max_tile_l=128)    # taps, multi-tile, B=2/step
    _run_case(keys[4], 2, 16, 8, 320, 5, 1, 2, max_tile_l=128)   # halo, fused taps, ragged L
    _run_case(keys[5], 2, 128, 16, 256, 3, 1, 1, max_tile_l=128,
              tol=1e-4)                                          # halo, accumulating taps
    _run_case(keys[6], 2, 4, 8, 16, 3, 2, 1)                     # stride=2 fallback

    print("KERNEL_OK")
</pallas_src>

<mosaic_0001>
module attributes {stable_mosaic.version = 11 : i64} {
  func.func @_conv1d_relu_taps_kernel(%arg0: i32, %arg1: i32, %arg2: memref<1x12x16xf32, #tpu.memory_space<vmem>>, %arg3: memref<8x12xf32, #tpu.memory_space<vmem>>, %arg4: memref<8x1xf32, #tpu.memory_space<vmem>>, %arg5: memref<1x8x16xf32, #tpu.memory_space<vmem>>) attributes {dimension_semantics = [#tpu.dimension_semantics<parallel>, #tpu.dimension_semantics<parallel>], iteration_bounds = array<i64: 2, 1>, scalar_prefetch = 0 : i64, scratch_operands = 0 : i64, tpu.core_type = #tpu.core_type<tc>, window_params = [{transform_indices = @transform_0, window_bounds = array<i64: 1, 12, 16>}, {pipeline_mode = #tpu.pipeline_mode<synchronous>, transform_indices = @transform_1, window_bounds = array<i64: 8, 12>}, {pipeline_mode = #tpu.pipeline_mode<synchronous>, transform_indices = @transform_2, window_bounds = array<i64: 8, 1>}, {transform_indices = @transform_3, window_bounds = array<i64: 1, 8, 16>}]} {
    %c0 = arith.constant 0 : index
    %c0_0 = arith.constant 0 : index
    %0 = vector.load %arg3[%c0, %c0_0] : memref<8x12xf32, #tpu.memory_space<vmem>>, vector<8x12xf32>
    %c0_1 = arith.constant 0 : index
    %c0_2 = arith.constant 0 : index
    %1 = vector.load %arg4[%c0_1, %c0_2] : memref<8x1xf32, #tpu.memory_space<vmem>>, vector<8x1xf32>
    %2 = vector.shape_cast %1 : vector<8x1xf32> to vector<8x1xf32>
    %3 = vector.broadcast %2 : vector<8x1xf32> to vector<8x16xf32>
    %c0_3 = arith.constant 0 : index
    %c0_4 = arith.constant 0 : index
    %c0_5 = arith.constant 0 : index
    %4 = vector.load %arg2[%c0_3, %c0_4, %c0_5] : memref<1x12x16xf32, #tpu.memory_space<vmem>>, vector<1x12x16xf32>
    %5 = vector.shape_cast %4 : vector<1x12x16xf32> to vector<12x16xf32>
    %cst = arith.constant dense<0.000000e+00> : vector<8x16xf32>
    %6 = tpu.matmul %0, %5, %cst {dimension_numbers = #tpu.dot_dimension_numbers<[1], [0], [0], [1], [0, 0, 1, 1], [], []>} : vector<8x12xf32>, vector<12x16xf32>, vector<8x16xf32> -> vector<8x16xf32>
    %7 = arith.addf %6, %3 : vector<8x16xf32>
    %cst_6 = arith.constant 0.000000e+00 : f32
    %8 = vector.broadcast %cst_6 : f32 to vector<8x16xf32>
    %9 = arith.maximumf %7, %8 : vector<8x16xf32>
    %c0_7 = arith.constant 0 : index
    %c0_8 = arith.constant 0 : index
    %c0_9 = arith.constant 0 : index
    %10 = vector.load %arg5[%c0_7, %c0_8, %c0_9] : memref<1x8x16xf32, #tpu.memory_space<vmem>>, vector<1x8x16xf32>
    %11 = vector.shape_cast %10 : vector<1x8x16xf32> to vector<8x16xf32>
    %12 = vector.shape_cast %9 : vector<8x16xf32> to vector<1x8x16xf32>
    tpu.vector_store %arg5[%c0_7, %c0_8, %c0_9], %12 {strides = array<i32>} : memref<1x8x16xf32, #tpu.memory_space<vmem>>, vector<1x8x16xf32>,
    return
  }
  func.func @transform_0(%arg0: i32, %arg1: i32) -> (i32, i32, i32) {
    %c0_i32 = arith.constant 0 : i32
    %c0_i32_0 = arith.constant 0 : i32
    return %arg0, %c0_i32, %arg1 : i32, i32, i32
  }
  func.func @transform_1(%arg0: i32, %arg1: i32) -> (i32, i32) {
    %c0_i32 = arith.constant 0 : i32
    %c0_i32_0 = arith.constant 0 : i32
    %c0_i32_1 = arith.constant 0 : i32
    return %c0_i32, %c0_i32_0 : i32, i32
  }
  func.func @transform_2(%arg0: i32, %arg1: i32) -> (i32, i32) {
    %c0_i32 = arith.constant 0 : i32
    %c0_i32_0 = arith.constant 0 : i32
    %c0_i32_1 = arith.constant 0 : i32
    return %c0_i32, %c0_i32_0 : i32, i32
  }
  func.func @transform_3(%arg0: i32, %arg1: i32) -> (i32, i32, i32) {
    %c0_i32 = arith.constant 0 : i32
    %c0_i32_0 = arith.constant 0 : i32
    return %arg0, %c0_i32, %arg1 : i32, i32, i32
  }
}

</mosaic_0001>

<bundles_post_ra>
// kernel: tpu_custom_call.1
= control target key start
LH: loop header
LB: loop body
LE: loop exit
PB: predicated region body
PF: predicated region fallthrough
CT: control target
= control target key end

     0   :  { %8 = vsyncpa [#allocation3], 0  ;;  %s664_s0 = inlined_call_operand.vmem [shape: f32[2,12,16], index: 0, kind: input, shape index: {}]   ;;  %s665_s1 = inlined_call_operand.vmem [shape: f32[8,12], index: 1, kind: input, shape index: {}]   ;;  %s666_s2 = inlined_call_operand.vmem [shape: f32[8,1], index: 2, kind: input, shape index: {}]   ;;  %s667_s3 = inlined_call_operand.hbm [shape: f32[2,8,16], index: 3, kind: output, shape index: {}]  }
   0x1   :  { %10 = vsyncpa [#allocation3 + $0x1], 0  ;;  %s559_s12 = smov 0   ;;  %s561_s13 = smov 0  }
   0x2   :  { %s563_s14 = smov 0   ;;  %s565_s15 = smov 0  }
   0x3   :  { %s567_s16 = smov 0   ;;  %s569_s17 = smov 0  }
   0x4 LB: > { %s373_s18 = sadd.s32 4294967295, %s533_s17   ;;  %s374_s19 = sadd.s32 4294967294, %s533_s17   ;;  %s533_s17 = sphi %s569_s17, %s16_s17   ;;  %s529_s16 = sphi %s567_s16, %s674_s16   ;;  %s525_s15 = sphi %s565_s15, %s673_s15   ;;  %s521_s14 = sphi %s563_s14, %s672_s14   ;;  %s517_s13 = sphi %s561_s13, %s671_s13   ;;  %s513_s12 = sphi %s559_s12, %s670_s12  }
   0x5   : > { %s28_s20 = sadd.s32 1, %s529_s16  ;;  %s107_s21 = sadd.s32 1, %s521_s14 }
   0x6   : > { %p30_p0 = scmp.ge.s32.totalorder %s28_s20, 2  ;;  %p117_p1 = scmp.ne.s32.totalorder %s521_s14, %s517_s13 }
   0x7   : > { %p118_p2 = scmp.eq.s32.totalorder %s373_s18, 1  ;;  %p123_p3 = scmp.ne.s32.totalorder %s517_s13, %s513_s12 }
   0x8   : > { %s676_s20 = smov (%p30_p0, %s28_s20), 0  ;;  %p124_p5 = scmp.eq.s32.totalorder %s374_s19, 1 }
   0x9   : > { %p599_p4 = por %p118_p2, %p117_p1  ;;  %s102_s23 = ssub.s32 %s529_s16, %s676_s20 }
   0xa   : > { %p377_p6 = scmp.ge.s32.totalorder %s533_s17, 1  ;;  %p105_p7 = scmp.eq.s32.totalorder %s102_s23, 0 }
   0xb   : > { %p606_p8 = por %p124_p5, %p123_p3  ;;  %p159_p9 = scmp.lt.s32.totalorder %s533_s17, 3 }
   0xc   : > { %s612_s25 = scalar_select %p105_p7, %s521_s14, %s107_s21  }
   0xd   : > { %p160_p10 = pnand %p377_p6, %p159_p9 }
   0xe   : > { %p186_p11 = scmp.lt.s32.totalorder (!%p160_p10), %s525_s15, 1  ;;  %s183_s8 = sand.u32 (!%p160_p10), 1, %s517_s13  }
   0xf   : > { %163 = sbr.rel (%p160_p10) target bundleno = 238 (0xee), region = 32  ;;  %s378_s9 = sshll.u32 (!%p160_p10), %s183_s8, 3 }
  0x10   : > { %s384_s10 = sshll.u32 (!%p160_p10), %s525_s15, 7  ;;  %s185_s11 = scalar_lea.vmem (!%p160_p10), [#allocation2], %s378_s9 }
  0x11   : > { %s299_s18 = sshll.u32 (!%p160_p10), %s185_s11, 4  ;;  %s297_s23 = scalar_lea.hbm (!%p160_p10), %s667_s3, %s384_s10  ;;  %s300_s18 = int_to_ptr.vmem [resolvable:$true] %s299_s18 }
  0x12   : > { %s285_s26 = scalar_lea.sflag (!%p160_p10), [#allocation3], %s183_s8  ;;  %s457_s27 = scalar_lea.vmem (!%p160_p10), %s300_s18, 128 }
  0x13   : > { %p458_p12 = scmp.ne.s32.totalorder (!%p160_p10), %s300_s18, %s457_s27 }
  0x14   : > { %v535_v0 = vmov 0.0   ;;  %vm536_vm0 = vmmov 0   ;;  %v195_v1 = vld [vmem:[%s666_s2] sm:$0xff]  ;;  %s187_s28 = scalar_select %p186_p11, %s525_s15, 1  ;;  %v537_v2 = vmov 0   ;;  %vm207_vm1 = vcmask 1043456  }
  0x15   : > { %391 = vmatprep.subr.mxu0 %v535_v0  ;;  %395 = vmatprep.mubr.msk.f32.mxu0 %vm536_vm0, %v535_v0  ;;  %v194_v5 = vld [vmem:[%s665_s1] sm:$0xff]  ;;  %vm203_vm2 = vcmask 97280   ;;  %vm282_vm3 = vcmask 130048   ;;  %p459_p13 = pnand %p458_p12, %p599_p4 }
  0x16   : > { %456 = vset.pattern.permute.xlu0 %v537_v2  ;;  %s387_s29 = sshll.u32 %s187_s28, 4  ;;  %s538_s28 = smov [#allocation2]  }
  0x17   : > { %198 = vperm.xlu0 %456, %v195_v1   ;;  %s193_s5 = scalar_lea.vmem %s664_s0, %s387_s29  ;;  %p460_p0 = pneg %p459_p13 }
  0x18   : > { %v202_v3 = vld [vmem:[%s193_s5 + $0x8] sm:$0xf]  ;;  %v201_v4 = vld [vmem:[%s193_s5] sm:$0xff]  ;;  %s461_s15 = sshll.u32 %s538_s28, 4  ;;  %s462_s15 = int_to_ptr.vmem [resolvable:$false] %s461_s15 }
  0x19   : > { %392 = vmatpush3.msk.msra.mxu0 %vm207_vm1, %v202_v3  ;;  %s463_s29 = scalar_lea.vmem %s462_s15, 256  ;;  %p464_p1 = scmp.lt.s32.totalorder %s300_s18, %s462_s15 }
  0x1a   : > { %393 = vmatprep.subr.mxu0 %v535_v0  ;;  %p465_p2 = scmp.lt.s32.totalorder %s463_s29, %s457_s27 }
  0x1b   : > { %394 = vmatpush3.msra.mxu0 %v201_v4 }
  0x1c   : > { %396 = vmatmul.mubr.msk.f32.vlgmr.msra.gmra.mxu0 %vm203_vm2, %v194_v5  ;;  %p466_p3 = por %p465_p2, %p464_p1 }
  0x1e   : > { %p467_p5 = pnand %p466_p3, %p460_p0 }
  0x92   : > { %v199_v6 = vpop.permute.xlu0 %198 }
  0xdc   : > { %v277_v7 = vpop.f32.mrf.mxu0 }
  0xdd   : > { %v278_v8 = vadd.f32 %v277_v7, %v199_v6 }
  0xde   : > { %v397_v9 = vpop.f32.mrf.mxu0 }
  0xdf   : > { %v281_v10 = vmax.f32 %v278_v8, 0.0 }
  0xe1   : > { %283 = vst.msk [vmem:[%s185_s11] sm:$0xff] %vm282_vm3, %v281_v10 }
  0xe2   : > { %470 = shalt.err (!%p467_p5)
}
  0xe3   : > { %s471_s30 = scalar_lea.hbm %s297_s23, 128  ;;  %s475_s6 = scalar_lea.hbm %s667_s3, 256 }
  0xe4   : > { %p472_p6 = scmp.ne.s32.totalorder %s297_s23, %s471_s30  ;;  %p476_p10 = scmp.lt.s32.totalorder %s297_s23, %s667_s3 }
  0xe5   : > { %p477_p11 = scmp.lt.s32.totalorder %s475_s6, %s471_s30 }
  0xe6   : > { %p473_p7 = pnand %p472_p6, %p599_p4 }
  0xe7   : > { %p478_p12 = por %p477_p11, %p476_p10 }
  0xe8   : > { %p474_p9 = pneg %p473_p7 }
  0xea   : > { %p479_p13 = pnand %p478_p12, %p474_p9 }
  0xec   : > { %482 = shalt.err (!%p479_p13)
}
  0xed   : > { %398 = dma.vmem_to_hbm [thread:$0]  (%p599_p4), %s300_s18, 128, %s297_s23, %s285_s26  }
  0xee PF: > { %p404_p0 = scmp.ge.s32.totalorder %s533_s17, 2  ;;  %s311_s9 = sand.u32 1, %s513_s12  }
  0xef   : > { %s312_s10 = scalar_lea.sflag [#allocation3], %s311_s9 }
  0xf0   : > { %p401_p1 = pnand %p404_p0, %p606_p8 }
  0xf2   : > { %p402_p2 = pneg %p401_p1 }
  0xf4   : > { %508 = dma.done.wait (%p402_p2), %s312_s10, 128  }
  0xf5   : > { %510 = vsyncadd (%p402_p2), %s312_s10, 4294967168  ;;  %s16_s17 = sadd.s32 1, %s533_s17   ;;  %s670_s12 = smov %s517_s13 }
  0xf6   : > { %p13_p3 = scmp.ge.s32.totalorder %s16_s17, 4   ;;  %s671_s13 = smov %s521_s14 }
  0xf7   : > { %s672_s14 = smov %s612_s25  ;;  %s673_s15 = smov %s529_s16 }
  0xf8   : > { %s674_s16 = smov %s676_s20  ;;  %15 = sbr.rel (!%p13_p3) target bundleno = 4 (0x4), region = 67 }
  0xfd   :  { %317 = vsyncpa [#allocation3], 1 }
  0xfe   :  { %319 = vsyncpa [#allocation3 + $0x1], 1 }

</bundles_post_ra>
